<compile_context>
chip_gen: v6e
topology: v6e:2x2x1
jax: 0.10.0
libtpu: 0.0.40
codegen_flags: <defaults>
</compile_context>

<pallas_src>
import functools

import jax
import jax.numpy as jnp
from jax.experimental import pallas as pl
from jax.experimental.pallas import tpu as pltpu


def _fusion_kernel(rgb_ref, kp_ref, w_rgb_ref, w_kp_ref, b_ref, out_ref, *,
                   compute_dtype):
    # rgb_ref / kp_ref: (C, tT) lane-dense activation tiles (batch dim squeezed).
    # w_rgb_ref / w_kp_ref: (C, C) static halves of the fusion weight.
    # b_ref: (C, 1) f32 bias.
    rgb = rgb_ref[...].astype(compute_dtype)
    kp = kp_ref[...].astype(compute_dtype)
    w_rgb = w_rgb_ref[...].astype(compute_dtype)
    w_kp = w_kp_ref[...].astype(compute_dtype)

    # Two K=C contractions into a single f32 accumulator: same MXU pushes as
    # one K=2C dot, but no VMEM concat copy.
    acc = jnp.dot(w_rgb, rgb, preferred_element_type=jnp.float32)
    acc = acc + jnp.dot(w_kp, kp, preferred_element_type=jnp.float32)
    acc = acc + b_ref[...]                       # f32 bias, broadcast over lanes
    out_ref[...] = acc.astype(out_ref.dtype)


def fusion_block(rgb_feat, kp_feat, weight, bias, *, compute_dtype=None,
                 out_dtype=None, max_lane_tile=8192):
    """MS-TCN FusionBlock forward.

    rgb_feat, kp_feat: (N, C, T); weight: (C, 2C) (or (C, 2C, 1) as in
    PyTorch Conv1d); bias: (C,).  Returns (N, C, T).
    """
    N, C, T = rgb_feat.shape
    assert kp_feat.shape == (N, C, T)
    if weight.ndim == 3:                         # PyTorch Conv1d weight (C, 2C, 1)
        weight = weight.reshape(weight.shape[0], weight.shape[1])
    assert weight.shape == (C, 2 * C)
    assert bias.shape == (C,)

    in_dtype = jnp.promote_types(rgb_feat.dtype, kp_feat.dtype)
    odt = out_dtype if out_dtype is not None else in_dtype
    cdt = compute_dtype if compute_dtype is not None else in_dtype

    # Static weight split (tiny, free) -> kills the in-kernel concat.
    w_rgb = weight[:, :C]
    w_kp = weight[:, C:]
    b2d = bias.astype(jnp.float32).reshape(C, 1)   # f32 accumulate + bias

    # Lane tiling along T: full extent when it fits (always a legal block),
    # otherwise a large multiple-of-128 tile with a cdiv grid (Pallas masks the
    # ragged last block).  No divisor search, no full-extent fallback.
    if T <= max_lane_tile:
        tT = T
    else:
        tT = max(128, max_lane_tile - (max_lane_tile % 128))
    grid = (N, pl.cdiv(T, tT))

    # VMEM budget: 2 activation inputs + 1 output, double-buffered, plus the
    # resident weight halves / bias.  Only ever raise the limit above the
    # 32 MiB scoped default; stay well under v7x's 64 MiB physical VMEM.
    act_tile_bytes = C * tT * jnp.dtype(in_dtype).itemsize
    out_tile_bytes = C * tT * jnp.dtype(odt).itemsize
    vmem_needed = 2 * 2 * act_tile_bytes + 2 * out_tile_bytes \
        + 2 * C * C * 4 + C * 4
    vmem_limit = int(min(48 * 1024 * 1024,
                         max(32 * 1024 * 1024, 2 * vmem_needed)))

    kernel = functools.partial(_fusion_kernel, compute_dtype=cdt)

    return pl.pallas_call(
        kernel,
        out_shape=jax.ShapeDtypeStruct((N, C, T), odt),
        grid=grid,
        in_specs=[
            pl.BlockSpec((None, C, tT), lambda n, j: (n, 0, j)),   # rgb tile
            pl.BlockSpec((None, C, tT), lambda n, j: (n, 0, j)),   # kp tile
            pl.BlockSpec((C, C), lambda n, j: (0, 0)),             # w_rgb
            pl.BlockSpec((C, C), lambda n, j: (0, 0)),             # w_kp
            pl.BlockSpec((C, 1), lambda n, j: (0, 0)),             # bias
        ],
        out_specs=pl.BlockSpec((None, C, tT), lambda n, j: (n, 0, j)),
        compiler_params=pltpu.CompilerParams(
            # Both grid axes (batch, T-tile) are independent -> megacore /
            # dual-TC sharding on v7x.
            dimension_semantics=("parallel", "parallel"),
            vmem_limit_bytes=vmem_limit,
        ),
    )(rgb_feat, kp_feat, w_rgb, w_kp, b2d)


def fusion_block_ref(rgb_feat, kp_feat, weight, bias):
    fused = jnp.concatenate([rgb_feat, kp_feat], axis=1)        # (N, 2C, T)
    out = jnp.einsum("oc,nct->not", weight, fused)
    return out + bias[None, :, None]


if __name__ == "__main__":
    key = jax.random.PRNGKey(0)
    k1, k2, k3, k4 = jax.random.split(key, 4)

    N, C, T = 2, 32, 64  # num_f_maps = 32
    rgb_feat = jax.random.normal(k1, (N, C, T), dtype=jnp.float32)
    kp_feat = jax.random.normal(k2, (N, C, T), dtype=jnp.float32)

    # Conv1d(2C, C, 1): weight (C, 2C, 1) -> (C, 2C)
    bound = 1.0 / jnp.sqrt(2.0 * C)
    weight = jax.random.uniform(k3, (C, 2 * C), minval=-bound, maxval=bound,
                                dtype=jnp.float32)
    bias = jax.random.uniform(k4, (C,), minval=-bound, maxval=bound,
                              dtype=jnp.float32)

    ref = fusion_block_ref(rgb_feat, kp_feat, weight, bias)

    # f32 compute path (no wrapper-side layout or dtype passes).
    out = jax.block_until_ready(fusion_block(rgb_feat, kp_feat, weight, bias))
    assert out.shape == (N, C, T)
    assert jnp.allclose(out, ref, atol=1e-5, rtol=1e-5)

    # bf16 compute path: cast happens inside the kernel, f32 accumulation.
    out_bf16 = jax.block_until_ready(
        fusion_block(rgb_feat, kp_feat, weight, bias,
                     compute_dtype=jnp.bfloat16))
    assert out_bf16.shape == (N, C, T)
    assert jnp.allclose(out_bf16, ref, atol=5e-2, rtol=5e-2)

    # Multi-step / ragged lane-tile path (cdiv grid, masked last block).
    T2 = 200
    rgb2 = jax.random.normal(k1, (N, C, T2), dtype=jnp.float32)
    kp2 = jax.random.normal(k2, (N, C, T2), dtype=jnp.float32)
    ref2 = fusion_block_ref(rgb2, kp2, weight, bias)
    out2 = jax.block_until_ready(
        fusion_block(rgb2, kp2, weight, bias, max_lane_tile=128))
    assert out2.shape == (N, C, T2)
    assert jnp.allclose(out2, ref2, atol=1e-5, rtol=1e-5)

    print("KERNEL_OK")
</pallas_src>

<mosaic_0001>
module attributes {stable_mosaic.version = 11 : i64} {
  func.func @_fusion_kernel(%arg0: i32, %arg1: i32, %arg2: memref<1x32x64xf32, #tpu.memory_space<vmem>>, %arg3: memref<1x32x64xf32, #tpu.memory_space<vmem>>, %arg4: memref<32x32xf32, #tpu.memory_space<vmem>>, %arg5: memref<32x32xf32, #tpu.memory_space<vmem>>, %arg6: memref<32x1xf32, #tpu.memory_space<vmem>>, %arg7: memref<1x32x64xf32, #tpu.memory_space<vmem>>) attributes {dimension_semantics = [#tpu.dimension_semantics<parallel>, #tpu.dimension_semantics<parallel>], iteration_bounds = array<i64: 2, 1>, scalar_prefetch = 0 : i64, scratch_operands = 0 : i64, tpu.core_type = #tpu.core_type<tc>, window_params = [{transform_indices = @transform_0, window_bounds = array<i64: 1, 32, 64>}, {transform_indices = @transform_1, window_bounds = array<i64: 1, 32, 64>}, {pipeline_mode = #tpu.pipeline_mode<synchronous>, transform_indices = @transform_2, window_bounds = array<i64: 32, 32>}, {pipeline_mode = #tpu.pipeline_mode<synchronous>, transform_indices = @transform_3, window_bounds = array<i64: 32, 32>}, {pipeline_mode = #tpu.pipeline_mode<synchronous>, transform_indices = @transform_4, window_bounds = array<i64: 32, 1>}, {transform_indices = @transform_5, window_bounds = array<i64: 1, 32, 64>}]} {
    %c0 = arith.constant 0 : index
    %c0_0 = arith.constant 0 : index
    %c0_1 = arith.constant 0 : index
    %0 = vector.load %arg2[%c0, %c0_0, %c0_1] : memref<1x32x64xf32, #tpu.memory_space<vmem>>, vector<1x32x64xf32>
    %1 = vector.shape_cast %0 : vector<1x32x64xf32> to vector<32x64xf32>
    %c0_2 = arith.constant 0 : index
    %c0_3 = arith.constant 0 : index
    %c0_4 = arith.constant 0 : index
    %2 = vector.load %arg3[%c0_2, %c0_3, %c0_4] : memref<1x32x64xf32, #tpu.memory_space<vmem>>, vector<1x32x64xf32>
    %3 = vector.shape_cast %2 : vector<1x32x64xf32> to vector<32x64xf32>
    %c0_5 = arith.constant 0 : index
    %c0_6 = arith.constant 0 : index
    %4 = vector.load %arg4[%c0_5, %c0_6] : memref<32x32xf32, #tpu.memory_space<vmem>>, vector<32x32xf32>
    %c0_7 = arith.constant 0 : index
    %c0_8 = arith.constant 0 : index
    %5 = vector.load %arg5[%c0_7, %c0_8] : memref<32x32xf32, #tpu.memory_space<vmem>>, vector<32x32xf32>
    %cst = arith.constant dense<0.000000e+00> : vector<32x64xf32>
    %6 = tpu.matmul %4, %1, %cst {dimension_numbers = #tpu.dot_dimension_numbers<[1], [0], [0], [1], [0, 0, 1, 1], [], []>} : vector<32x32xf32>, vector<32x64xf32>, vector<32x64xf32> -> vector<32x64xf32>
    %cst_9 = arith.constant dense<0.000000e+00> : vector<32x64xf32>
    %7 = tpu.matmul %5, %3, %cst_9 {dimension_numbers = #tpu.dot_dimension_numbers<[1], [0], [0], [1], [0, 0, 1, 1], [], []>} : vector<32x32xf32>, vector<32x64xf32>, vector<32x64xf32> -> vector<32x64xf32>
    %8 = arith.addf %6, %7 : vector<32x64xf32>
    %c0_10 = arith.constant 0 : index
    %c0_11 = arith.constant 0 : index
    %9 = vector.load %arg6[%c0_10, %c0_11] : memref<32x1xf32, #tpu.memory_space<vmem>>, vector<32x1xf32>
    %10 = vector.broadcast %9 : vector<32x1xf32> to vector<32x64xf32>
    %11 = arith.addf %8, %10 : vector<32x64xf32>
    %c0_12 = arith.constant 0 : index
    %c0_13 = arith.constant 0 : index
    %c0_14 = arith.constant 0 : index
    %12 = vector.load %arg7[%c0_12, %c0_13, %c0_14] : memref<1x32x64xf32, #tpu.memory_space<vmem>>, vector<1x32x64xf32>
    %13 = vector.shape_cast %12 : vector<1x32x64xf32> to vector<32x64xf32>
    %14 = vector.shape_cast %11 : vector<32x64xf32> to vector<1x32x64xf32>
    tpu.vector_store %arg7[%c0_12, %c0_13, %c0_14], %14 {strides = array<i32>} : memref<1x32x64xf32, #tpu.memory_space<vmem>>, vector<1x32x64xf32>,
    return
  }
  func.func @transform_0(%arg0: i32, %arg1: i32) -> (i32, i32, i32) {
    %c0_i32 = arith.constant 0 : i32
    %c0_i32_0 = arith.constant 0 : i32
    return %arg0, %c0_i32, %arg1 : i32, i32, i32
  }
  func.func @transform_1(%arg0: i32, %arg1: i32) -> (i32, i32, i32) {
    %c0_i32 = arith.constant 0 : i32
    %c0_i32_0 = arith.constant 0 : i32
    return %arg0, %c0_i32, %arg1 : i32, i32, i32
  }
  func.func @transform_2(%arg0: i32, %arg1: i32) -> (i32, i32) {
    %c0_i32 = arith.constant 0 : i32
    %c0_i32_0 = arith.constant 0 : i32
    %c0_i32_1 = arith.constant 0 : i32
    return %c0_i32, %c0_i32_0 : i32, i32
  }
  func.func @transform_3(%arg0: i32, %arg1: i32) -> (i32, i32) {
    %c0_i32 = arith.constant 0 : i32
    %c0_i32_0 = arith.constant 0 : i32
    %c0_i32_1 = arith.constant 0 : i32
    return %c0_i32, %c0_i32_0 : i32, i32
  }
  func.func @transform_4(%arg0: i32, %arg1: i32) -> (i32, i32) {
    %c0_i32 = arith.constant 0 : i32
    %c0_i32_0 = arith.constant 0 : i32
    %c0_i32_1 = arith.constant 0 : i32
    return %c0_i32, %c0_i32_0 : i32, i32
  }
  func.func @transform_5(%arg0: i32, %arg1: i32) -> (i32, i32, i32) {
    %c0_i32 = arith.constant 0 : i32
    %c0_i32_0 = arith.constant 0 : i32
    return %arg0, %c0_i32, %arg1 : i32, i32, i32
  }
}

</mosaic_0001>

<bundles_post_ra>
// kernel: tpu_custom_call.1
= control target key start
LH: loop header
LB: loop body
LE: loop exit
PB: predicated region body
PF: predicated region fallthrough
CT: control target
= control target key end

     0   :  { %s1314_s0 = inlined_call_operand.hbm [shape: f32[2,32,64], index: 0, kind: input, shape index: {}]   ;;  %s1315_s1 = inlined_call_operand.hbm [shape: f32[2,32,64], index: 1, kind: input, shape index: {}]   ;;  %s1316_s2 = inlined_call_operand.vmem [shape: f32[32,32], index: 2, kind: input, shape index: {}]   ;;  %s1317_s3 = inlined_call_operand.hbm [shape: f32[32,32], index: 3, kind: input, shape index: {}]   ;;  %s1318_s4 = inlined_call_operand.vmem [shape: f32[32,1], index: 4, kind: input, shape index: {}]   ;;  %s1319_s5 = inlined_call_operand.hbm [shape: f32[2,32,64], index: 5, kind: output, shape index: {}]  }
   0x1   :  { %1326 = sst [smem:[#allocation16_spill]] %s1317_s3 }
   0x2   :  { %10 = vsyncpa [#allocation3], 0 }
   0x3   :  { %12 = vsyncpa [#allocation3 + $0x1], 0 }
   0x4   :  { %13 = vsyncpa [#allocation6], 0 }
   0x5   :  { %15 = vsyncpa [#allocation6 + $0x1], 0 }
   0x6   :  { %16 = vsyncpa [#allocation4], 0 }
   0x7   :  { %18 = vsyncpa [#allocation4 + $0x1], 0  ;;  %s1067_s18 = smov 0   ;;  %s1069_s19 = smov 0  }
   0x8   :  { %s1071_s20 = smov 0   ;;  %s1073_s21 = smov 0  }
   0x9   :  { %s1075_s22 = smov 0   ;;  %s1077_s23 = smov 0  }
   0xa LB: > { %1327 = sst [smem:[#allocation13_spill]] %s1022_s22  ;;  %s1098_s24 = sadd.s32 4294967295, %s1026_s23   ;;  %s1026_s23 = sphi %s1077_s23, %s24_s23   ;;  %s1022_s22 = sphi %s1075_s22, %s1345_s22   ;;  %s1018_s21 = sphi %s1073_s21, %s1344_s21   ;;  %s1014_s20 = sphi %s1071_s20, %s1348_s20   ;;  %s1010_s19 = sphi %s1069_s19, %s1347_s19   ;;  %s1006_s18 = sphi %s1067_s18, %s1346_s18  }
   0xb   : > { %s696_s25 = sadd.s32 4294967294, %s1026_s23   ;;  %p58_p0 = scmp.ne.s32.totalorder %s1010_s19, %s1006_s18 }
   0xc   : > { %p59_p1 = scmp.eq.s32.totalorder %s1098_s24, 0  ;;  %p181_p3 = scmp.eq.s32.totalorder %s696_s25, 1 }
   0xd   : > { %p697_p5 = scmp.ge.s32.totalorder %s1026_s23, 1  ;;  %p188_p7 = scmp.lt.s32.totalorder %s1026_s23, 3 }
   0xe   : > { %p1107_p4 = por %p59_p1, %p58_p0  ;;  %p1112_p6 = por %p181_p3, %p58_p0 }
   0xf   : > { %p1117_p8 = pnand %p697_p5, %p188_p7  ;;  %s1028_s29 = smov [#allocation7]  }
  0x10   : > { %s1329_s27 = scalar_select %p1112_p6, 1, 0 }
  0x11   : > { %s203_s30 = sshll.u32 %s1028_s29, 4  ;;  %p781_p9 = pneg %p1117_p8  ;;  %s204_s30 = int_to_ptr.vmem [resolvable:$true] %s203_s30 }
  0x12   : > { %s36_s7 = sadd.s32 1, %s1022_s22  ;;  %s867_s8 = scalar_lea.vmem %s204_s30, 512 }
  0x13   : > { %p1126_p11 = pnand %p781_p9, %p59_p1  ;;  %p868_p13 = scmp.ne.s32.totalorder %s204_s30, %s867_s8 }
  0x14   : > { %p875_p5 = scmp.lt.s32.totalorder %s204_s30, %s204_s30  ;;  %p876_p7 = scmp.lt.s32.totalorder %s867_s8, %s867_s8 }
  0x15   : > { %p858_p12 = pneg %p1126_p11 }
  0x16   : > { %p877_p2 = por %p876_p7, %p875_p5 }
  0x17   : > { %p870_p0 = pnand %p868_p13, %p858_p12 }
  0x19   : > { %p871_p3 = pneg %p870_p0 }
  0x1b   : > { %p878_p6 = pnand %p877_p2, %p871_p3 }
  0x1d   : > { %881 = shalt.err (!%p878_p6)
}
  0x1e   : > { %s1320_s9 = smov 128   ;;  %s1322_s10 = smov 8  }
  0x1f   : > { %s1332_s3 = sld [smem:[#allocation16_spill]]  ;;  %p38_p2 = scmp.ge.s32.totalorder %s36_s7, 2 }
  0x20   : > { %s45_s13 = sadd.s32 1, %s1014_s20  ;;  %p52_p6 = scmp.ne.s32.totalorder %s1014_s20, %s1010_s19 }
  0x21   : > { %p53_p9 = scmp.eq.s32.totalorder %s1026_s23, 0  ;;  %s1350_s7 = smov (%p38_p2, %s36_s7), 0 }
  0x22   : > { %1333 = sst [smem:[#allocation14_spill]] %s1350_s7  ;;  %p1335_p13 = scmp.eq.s32.totalorder %s1098_s24, 1 }
  0x23   : > { %p1147_p12 = por %p53_p9, %p52_p6  ;;  %s40_s16 = ssub.s32 %s1022_s22, %s1350_s7 }
  0x24   : > { %p1153_p0 = por %p1335_p13, %p52_p6  ;;  %p797_p3 = scmp.lt.s32.totalorder %s1026_s23, 2 }
  0x25   : > { %784 = dma.hbm_to_vmem [thread:$0]  (!%p1126_p11), %s1332_s3, 512, %s204_s30, [#allocation6], %s1320_s9, %s1320_s9, %s1322_s10  }
  0x26   : > { %p43_p11 = scmp.eq.s32.totalorder %s40_s16, 0  ;;  %s220_s17 = sand.u32 1, %s1014_s20  }
  0x27   : > { %s700_s25 = sshll.u32 %s220_s17, 5  ;;  %s724_s30 = sshll.u32 %s1022_s22, 9 }
  0x28   : > { %s1162_s29 = scalar_select %p43_p11, %s1014_s20, %s45_s13  }
  0x29   : > { %s231_s11 = scalar_lea.hbm %s1314_s0, %s724_s30  ;;  %s224_s12 = scalar_lea.vmem [#allocation2], %s700_s25 }
  0x2a   : > { %1337 = sst [smem:[#allocation15_spill]] %s1162_s29  ;;  %s232_s9 = sshll.u32 %s224_s12, 4  ;;  %s233_s9 = int_to_ptr.vmem [resolvable:$true] %s232_s9 }
  0x2b   : > { %p1170_p5 = pnand %p797_p3, %p1147_p12  ;;  %s1177_s13 = scalar_lea.hbm %s1315_s1, %s724_s30 }
  0x2c   : > { %s246_s16 = scalar_lea.vmem [#allocation5], %s700_s25  ;;  %s221_s29 = scalar_lea.sflag [#allocation3], %s220_s17 }
  0x2d   : > { %s254_s22 = sshll.u32 %s246_s16, 4  ;;  %p884_p7 = pneg %p1170_p5  ;;  %s255_s22 = int_to_ptr.vmem [resolvable:$true] %s254_s22 }
  0x2e   : > { %s895_s6 = scalar_lea.vmem %s233_s9, 512  ;;  %s1031_s14 = smov [#allocation2]  }
  0x2f   : > { %p896_p2 = scmp.ne.s32.totalorder %s233_s9, %s895_s6  ;;  %s900_s8 = sshll.u32 %s1031_s14, 4  ;;  %s901_s8 = int_to_ptr.vmem [resolvable:$false] %s900_s8 }
  0x30   : > { %s902_s12 = scalar_lea.vmem %s901_s8, 1024  ;;  %p903_p12 = scmp.lt.s32.totalorder %s233_s9, %s901_s8 }
  0x31   : > { %p898_p6 = pnand %p896_p2, %p884_p7  ;;  %p904_p13 = scmp.lt.s32.totalorder %s902_s12, %s895_s6 }
  0x33   : > { %p899_p9 = pneg %p898_p6  ;;  %p905_p3 = por %p904_p13, %p903_p12 }
  0x35   : > { %p906_p11 = pnand %p905_p3, %p899_p9 }
  0x37   : > { %909 = shalt.err (!%p906_p11)
}
  0x38   : > { %s1339_s3 = smov 8   ;;  %s1340_s7 = smov 128  }
  0x39   : > { %788 = dma.hbm_to_vmem [thread:$0]  (!%p1170_p5), %s231_s11, 512, %s233_s9, %s221_s29, %s1340_s7, %s1340_s7, %s1339_s3  }
  0x3a   : > { %s242_s17 = sand.u32 1, %s1026_s23   ;;  %s923_s30 = scalar_lea.vmem %s255_s22, 512 }
  0x3b   : > { %s243_s25 = scalar_lea.sflag [#allocation6], %s242_s17  ;;  %p924_p2 = scmp.ne.s32.totalorder %s255_s22, %s923_s30 }
  0x3c   : > { %s1032_s16 = smov [#allocation5]  }
  0x3d   : > { %p926_p6 = pnand %p924_p2, %p884_p7  ;;  %s928_s6 = sshll.u32 %s1032_s16, 4  ;;  %s929_s6 = int_to_ptr.vmem [resolvable:$false] %s928_s6 }
  0x3e   : > { %s930_s14 = scalar_lea.vmem %s929_s6, 1024  ;;  %p931_p9 = scmp.lt.s32.totalorder %s255_s22, %s929_s6 }
  0x3f   : > { %p927_p10 = pneg %p926_p6  ;;  %p932_p12 = scmp.lt.s32.totalorder %s930_s14, %s923_s30 }
  0x41   : > { %p933_p13 = por %p932_p12, %p931_p9 }
  0x43   : > { %p934_p3 = pnand %p933_p13, %p927_p10 }
  0x45   : > { %937 = shalt.err (!%p934_p3)
}
  0x46   : > { %791 = dma.hbm_to_vmem [thread:$0]  (!%p1170_p5), %s1177_s13, 512, %s255_s22, %s243_s25, %s1340_s7, %s1340_s7, %s1339_s3  }
  0x47   : > { %266 = sbr.rel (%p1117_p8) target bundleno = 310 (0x136), region = 40  ;;  %s1202_s9 = sand.u32 (!%p1117_p8), 1, %s1010_s19  }
  0x48   : > { %s1205_s29 = sshll.u32 (!%p1117_p8), %s1202_s9, 5  ;;  %s269_s11 = scalar_lea.sflag (!%p1117_p8), [#allocation3], %s1202_s9 }
  0x49   : > { %s272_s8 = scalar_lea.vmem (!%p1117_p8), [#allocation2], %s1205_s29 }
  0x4c   : > { %989 = dma.done.wait (%p1107_p4), %s269_s11, 512  }
  0x4d   : > { %991 = vsyncadd (%p1107_p4), %s269_s11, 4294966784  ;;  %s277_s22 = sand.u32 1, %s1098_s24   ;;  %s281_s10 = scalar_lea.vmem [#allocation5], %s1205_s29 }
  0x4e   : > { %s278_s28 = scalar_lea.sflag [#allocation6], %s277_s22 }
  0x4f   : > { %993 = dma.done.wait (%p1107_p4), %s278_s28, 512  }
  0x50   : > { %995 = vsyncadd (%p1107_p4), %s278_s28, 4294966784 }
  0x51   : > { %997 = dma.done.wait (%p59_p1), [#allocation6], 512  }
  0x52   : > { %999 = vsyncadd (%p59_p1), [#allocation6], 4294966784  ;;  %v1033_v0 = vmov 0   ;;  %v324_v1 = vld [vmem:[%s281_s10 + $0x18] sm:$0xff]  ;;  %v323_v3 = vld [vmem:[%s281_s10 + $0x10] sm:$0xff]  ;;  %vm333_vm0 = vcmask 261120  }
  0x53   : > { %854 = vset.pattern.permute.xlu0 %v1033_v0  ;;  %855 = vset.pattern.permute.xlu1 %v1033_v0  ;;  %v320_v2 = vld [vmem:[%s272_s8 + $0x18] sm:$0xff]  ;;  %v319_v4 = vld [vmem:[%s272_s8 + $0x10] sm:$0xff]  ;;  %v322_v5 = vld [vmem:[%s281_s10 + $0x8] sm:$0xff]  ;;  %vm556_vm1 = vcmask 523264   ;;  %s726_s26 = sshll.u32 %s1018_s21, 9  ;;  %s562_s21 = scalar_lea.sflag [#allocation4], %s1202_s9 }
  0x54   : > { %743 = vmatprep.subr.mxu0 %v324_v1  ;;  %757 = vmatprep.subr.mxu1 %v320_v2  ;;  %v318_v6 = vld [vmem:[%s272_s8 + $0x8] sm:$0xff]  ;;  %v321_v7 = vld [vmem:[%s281_s10] sm:$0xff]  ;;  %v331_v13 = vld [vmem:[#allocation7 + $0x10] sm:$0xff]  ;;  %s316_s10 = scalar_lea.vmem [#allocation8], %s1205_s29  ;;  %s1264_s12 = scalar_lea.hbm %s1319_s5, %s726_s26 }
  0x55   : > { %744 = vmatpush3.msra.mxu0 %v324_v1  ;;  %758 = vmatpush3.msra.mxu1 %v320_v2  ;;  %v317_v8 = vld [vmem:[%s272_s8] sm:$0xff]  ;;  %v330_v11 = vld [vmem:[#allocation7 + $0x8] sm:$0xff]  ;;  %v327_v14 = vld [vmem:[%s1316_s2 + $0x10] sm:$0xff]  ;;  %s576_s24 = sshll.u32 %s316_s10, 4  ;;  %s1034_s7 = smov [#allocation8]   ;;  %s1258_s24 = int_to_ptr.vmem [resolvable:$true] %s576_s24 }
  0x56   : > { %745 = vmatprep.subr.mxu0 %v323_v3  ;;  %759 = vmatprep.subr.mxu1 %v319_v4  ;;  %v329_v9 = vld [vmem:[#allocation7] sm:$0xff]  ;;  %v326_v12 = vld [vmem:[%s1316_s2 + $0x8] sm:$0xff]  ;;  %v530_v16 = vld [vmem:[%s1318_s4 + $0x10] sm:$0xff]  ;;  %s938_s3 = scalar_lea.vmem %s1258_s24, 512  ;;  %s942_s17 = sshll.u32 %s1034_s7, 4  ;;  %s943_s17 = int_to_ptr.vmem [resolvable:$false] %s942_s17 }
  0x57   : > { %746 = vmatpush3.msra.mxu0 %v323_v3  ;;  %760 = vmatpush3.msra.mxu1 %v319_v4  ;;  %v325_v10 = vld [vmem:[%s1316_s2] sm:$0xff]  ;;  %v332_v17 = vld [vmem:[#allocation7 + $0x18] sm:$0xff]  ;;  %v529_v19 = vld [vmem:[%s1318_s4 + $0x8] sm:$0xff]  ;;  %p939_p1 = scmp.ne.s32.totalorder %s1258_s24, %s938_s3  ;;  %s944_s25 = scalar_lea.vmem %s943_s17, 1024 }
  0x58   : > { %747 = vmatprep.subr.mxu0 %v322_v5  ;;  %761 = vmatprep.subr.mxu1 %v318_v6  ;;  %v528_v15 = vld [vmem:[%s1318_s4] sm:$0xff]  ;;  %v328_v18 = vld [vmem:[%s1316_s2 + $0x18] sm:$0xff]  ;;  %p945_p10 = scmp.lt.s32.totalorder %s1258_s24, %s943_s17  ;;  %p946_p5 = scmp.lt.s32.totalorder %s944_s25, %s938_s3 }
  0x59   : > { %748 = vmatpush3.msra.mxu0 %v322_v5  ;;  %762 = vmatpush3.msra.mxu1 %v318_v6  ;;  %v531_v20 = vld [vmem:[%s1318_s4 + $0x18] sm:$0xff]  ;;  %p940_p4 = pnand %p939_p1, %p1153_p0 }
  0x5a   : > { %749 = vmatprep.subr.mxu0 %v321_v7  ;;  %763 = vmatprep.subr.mxu1 %v317_v8  ;;  %p947_p7 = por %p946_p5, %p945_p10 }
  0x5b   : > { %750 = vmatpush3.msra.mxu0 %v321_v7  ;;  %751 = vmatprep.mubr.msk.f32.mxu0 %vm333_vm0, %v329_v9  ;;  %p941_p8 = pneg %p940_p4 }
  0x5c   : > { %764 = vmatpush3.msra.mxu1 %v317_v8  ;;  %765 = vmatprep.mubr.msk.f32.mxu1 %vm333_vm0, %v325_v10 }
  0x5d   : > { %752 = vmatmul.mubr.msk.f32.vlgmr.msra.gmra.mxu0 %vm333_vm0, %v330_v11  ;;  %766 = vmatmul.mubr.msk.f32.vlgmr.msra.gmra.mxu1 %vm333_vm0, %v326_v12  ;;  %p948_p11 = pnand %p947_p7, %p941_p8 }
  0x5e   : > { %754 = vmatprep.mubr.msk.f32.mxu0 %vm333_vm0, %v331_v13  ;;  %768 = vmatprep.mubr.msk.f32.mxu1 %vm333_vm0, %v327_v14 }
  0x5f   : > { %534 = vperm.xlu0 %854, %v528_v15   ;;  %544 = vperm.xlu1 %855, %v530_v16  }
  0x61   : > { %755 = vmatmul.mubr.msk.f32.gmra.mxu0 %vm333_vm0, %v332_v17  ;;  %769 = vmatmul.mubr.msk.f32.gmra.mxu1 %vm333_vm0, %v328_v18 }
  0x63   : > { %539 = vperm.xlu0 %854, %v529_v19   ;;  %549 = vperm.xlu1 %855, %v531_v20  }
  0xda   : > { %v535_v21 = vpop.permute.xlu0 %534  ;;  %v545_v22 = vpop.permute.xlu1 %544 }
  0xde   : > { %v540_v23 = vpop.permute.xlu0 %539  ;;  %v550_v34 = vpop.permute.xlu1 %549 }
 0x11d   : > { %v753_v24 = vpop.f32.mrf.mxu0  ;;  %v767_v25 = vpop.f32.mrf.mxu1 }
 0x11e   : > { %v515_v26 = vadd.f32 %v767_v25, %v753_v24 }
 0x11f   : > { %v412_v27 = vpop.f32.mrf.mxu0  ;;  %v509_v28 = vpop.f32.mrf.mxu1 }
 0x120   : > { %v553_v29 = vadd.f32 %v540_v23, %v515_v26  ;;  %v510_v30 = vadd.f32 %v509_v28, %v412_v27 }
 0x121   : > { %v756_v31 = vpop.f32.mrf.mxu0  ;;  %v770_v32 = vpop.f32.mrf.mxu1 }
 0x122   : > { %558 = vst.msk [vmem:[%s316_s10 + $0x8] sm:$0xff] %vm556_vm1, %v553_v29  ;;  %v552_v33 = vadd.f32 %v535_v21, %v510_v30  ;;  %v525_v35 = vadd.f32 %v770_v32, %v756_v31 }
 0x123   : > { %v422_v36 = vpop.f32.mrf.mxu0  ;;  %v519_v37 = vpop.f32.mrf.mxu1 }
 0x124   : > { %557 = vst.msk [vmem:[%s316_s10] sm:$0xff] %vm556_vm1, %v552_v33  ;;  %v555_v38 = vadd.f32 %v550_v34, %v525_v35  ;;  %v520_v39 = vadd.f32 %v519_v37, %v422_v36 }
 0x126   : > { %560 = vst.msk [vmem:[%s316_s10 + $0x18] sm:$0xff] %vm556_vm1, %v555_v38  ;;  %v554_v40 = vadd.f32 %v545_v22, %v520_v39 }
 0x128   : > { %559 = vst.msk [vmem:[%s316_s10 + $0x10] sm:$0xff] %vm556_vm1, %v554_v40 }
 0x129   : > { %951 = shalt.err (!%p948_p11)
}
 0x12a   : > { %s952_s30 = scalar_lea.hbm %s1264_s12, 512  ;;  %s956_s14 = scalar_lea.hbm %s1319_s5, 1024 }
 0x12b   : > { %p953_p2 = scmp.ne.s32.totalorder %s1264_s12, %s952_s30  ;;  %p957_p12 = scmp.lt.s32.totalorder %s1264_s12, %s1319_s5 }
 0x12c   : > { %p958_p13 = scmp.lt.s32.totalorder %s956_s14, %s952_s30 }
 0x12d   : > { %p954_p6 = pnand %p953_p2, %p1153_p0 }
 0x12e   : > { %p959_p3 = por %p958_p13, %p957_p12 }
 0x12f   : > { %p955_p9 = pneg %p954_p6 }
 0x131   : > { %p960_p1 = pnand %p959_p3, %p955_p9 }
 0x133   : > { %963 = shalt.err (!%p960_p1)
}
 0x134   : > { %s1035_s22 = smov 128   ;;  %s1036_s28 = smov 8  }
 0x135   : > { %779 = dma.vmem_to_hbm [thread:$0]  (%p1153_p0), %s1258_s24, 512, %s1264_s12, %s562_s21, %s1035_s22, %s1035_s22, %s1036_s28  }
 0x136 PF: > { %s591_s10 = sand.u32 1, %s1006_s18   ;;  %p1341_p4 = scmp.ne.s32.totalorder %s1329_s27, 0 }
 0x137   : > { %p1342_p8 = scmp.ge.s32.totalorder %s1026_s23, 2  ;;  %s592_s26 = scalar_lea.sflag [#allocation4], %s591_s10 }
 0x139   : > { %p793_p10 = pnand %p1342_p8, %p1341_p4 }
 0x13b   : > { %p794_p5 = pneg %p793_p10 }
 0x13d   : > { %1001 = dma.done.wait (%p794_p5), %s592_s26, 512  }
 0x13e   : > { %1003 = vsyncadd (%p794_p5), %s592_s26, 4294966784  ;;  %s24_s23 = sadd.s32 1, %s1026_s23   ;;  %s1343_s15 = sld [smem:[#allocation15_spill]] }
 0x13f   : > { %p21_p7 = scmp.ge.s32.totalorder %s24_s23, 4   ;;  %s1344_s21 = sld [smem:[#allocation13_spill]] }
 0x140   : > { %s1345_s22 = sld [smem:[#allocation14_spill]]  ;;  %s1346_s18 = smov %s1010_s19 }
 0x141   : > { %s1347_s19 = smov %s1014_s20  ;;  %23 = sbr.rel (!%p21_p7) target bundleno = 10 (0xa), region = 102 }
 0x144   : > { %s1348_s20 = smov %s1343_s15 }
 0x146   :  { %597 = vsyncpa [#allocation3], 1 }
 0x147   :  { %599 = vsyncpa [#allocation3 + $0x1], 1 }
 0x148   :  { %600 = vsyncpa [#allocation6], 1 }
 0x149   :  { %602 = vsyncpa [#allocation6 + $0x1], 1 }
 0x14a   :  { %603 = vsyncpa [#allocation4], 1 }
 0x14b   :  { %605 = vsyncpa [#allocation4 + $0x1], 1 }

</bundles_post_ra>
